<compile_context>
chip_gen: v6e
topology: v6e:2x2x1
jax: 0.10.0
libtpu: 0.0.40
codegen_flags: <defaults>
</compile_context>

<pallas_src>
import jax
import jax.numpy as jnp
from jax.experimental import pallas as pl
from jax.experimental.pallas import tpu as pltpu


def _normalize_kernel(scale_ref, bias_ref, x_ref, o_ref):
    # scale_ref, bias_ref: (TR, 1) f32 per-row constants (broadcast over lanes)
    # x_ref, o_ref:        (TR, TC) streaming tiles
    x = x_ref[...].astype(jnp.float32)            # widen narrow dtypes for the math
    y = x * scale_ref[...] + bias_ref[...]        # (x - m) / s == x*(1/s) + (-m/s)
    o_ref[...] = y.astype(o_ref.dtype)


_TARGET_BLOCK_BYTES = 2 << 20  # ~2 MiB per streaming block: amortizes the ~0.35us
                               # per-grid-step pipeline cost while keeping the
                               # double-buffered VMEM footprint small on every chip.


def _pick_tiles(rows: int, hw: int) -> tuple[int, int]:
    """Pick (TR, TC) respecting the (8, 128) tiling constraint.

    A block dim is legal if it is a multiple of the tiling quantum OR equals the
    full array extent.
    """
    elem = 4  # math/output are f32
    row_bytes = hw * elem
    if row_bytes <= _TARGET_BLOCK_BYTES:
        # Whole rows fit comfortably: take the full lane extent and stack rows.
        tc = hw
        tr = max(1, _TARGET_BLOCK_BYTES // row_bytes)
        if tr >= rows:
            tr = rows                              # full extent: always legal
        else:
            tr = max(8, (tr // 8) * 8)             # sublane quantum
            tr = min(tr, rows)
    else:
        # A single row exceeds the budget: tile along the lane axis too.
        tr = rows if rows <= 8 else 8
        tc = max(128, (_TARGET_BLOCK_BYTES // (tr * elem) // 128) * 128)
        tc = min(tc, hw)
    return tr, tc


def image_normalize(x: jax.Array, m_: jax.Array, s_: jax.Array) -> jax.Array:
    """(x - m) / s with per-channel mean/std broadcast, NCHW layout."""
    B, C, H, W = x.shape
    m = m_.reshape(C).astype(jnp.float32)
    s = s_.reshape(C).astype(jnp.float32)

    # Fold mean/std into scale/bias once (C-length, negligible wrapper cost).
    scale_c = 1.0 / s
    bias_c = -m * scale_c

    rows = B * C
    hw = H * W
    out_dtype = jnp.result_type(x.dtype, jnp.float32)  # match torch promotion

    # Lane-dense 2D slab: row r = b*C + c, so per-row constants tile over batch.
    x2 = x.reshape(rows, hw)
    scale = jnp.tile(scale_c, B).reshape(rows, 1)
    bias = jnp.tile(bias_c, B).reshape(rows, 1)

    tr, tc = _pick_tiles(rows, hw)
    grid = (pl.cdiv(rows, tr), pl.cdiv(hw, tc))

    out2 = pl.pallas_call(
        _normalize_kernel,
        out_shape=jax.ShapeDtypeStruct((rows, hw), out_dtype),
        grid=grid,
        in_specs=[
            pl.BlockSpec((tr, 1), lambda i, j: (i, 0)),    # scale (per-row)
            pl.BlockSpec((tr, 1), lambda i, j: (i, 0)),    # bias  (per-row)
            pl.BlockSpec((tr, tc), lambda i, j: (i, j)),   # x tile
        ],
        out_specs=pl.BlockSpec((tr, tc), lambda i, j: (i, j)),
        compiler_params=pltpu.CompilerParams(
            dimension_semantics=("parallel", "parallel"),
        ),
    )(scale, bias, x2)

    return out2.reshape(B, C, H, W)


if __name__ == "__main__":
    key = jax.random.PRNGKey(0)
    kx, km, ks = jax.random.split(key, 3)

    B, C, H, W = 2, 4, 16, 16
    x = jax.random.normal(kx, (B, C, H, W), dtype=jnp.float32)
    # Deterministic per-channel "dataset statistics" (equivalent to the (C,1,1)
    # numpy buffers passed to the PyTorch module's __init__).
    m_ = jax.random.normal(km, (C, 1, 1), dtype=jnp.float32) * 0.1 + 0.5
    s_ = jax.random.uniform(ks, (C, 1, 1), dtype=jnp.float32, minval=0.2, maxval=1.0)

    out = image_normalize(x, m_, s_)
    out = jax.block_until_ready(out)

    # Reference check against plain-JAX broadcasting semantics (same as torch).
    ref = (x - m_.reshape(1, C, 1, 1)) / s_.reshape(1, C, 1, 1)
    assert out.shape == ref.shape
    assert jnp.allclose(out, ref, atol=1e-5, rtol=1e-5)

    print("KERNEL_OK")
</pallas_src>

<mosaic_0001>
module attributes {stable_mosaic.version = 11 : i64} {
  func.func @_normalize_kernel(%arg0: i32, %arg1: i32, %arg2: memref<8x1xf32, #tpu.memory_space<vmem>>, %arg3: memref<8x1xf32, #tpu.memory_space<vmem>>, %arg4: memref<8x256xf32, #tpu.memory_space<vmem>>, %arg5: memref<8x256xf32, #tpu.memory_space<vmem>>) attributes {dimension_semantics = [#tpu.dimension_semantics<parallel>, #tpu.dimension_semantics<parallel>], iteration_bounds = array<i64: 1, 1>, scalar_prefetch = 0 : i64, scratch_operands = 0 : i64, tpu.core_type = #tpu.core_type<tc>, window_params = [{transform_indices = @transform_0, window_bounds = array<i64: 8, 1>}, {transform_indices = @transform_1, window_bounds = array<i64: 8, 1>}, {transform_indices = @transform_2, window_bounds = array<i64: 8, 256>}, {transform_indices = @transform_3, window_bounds = array<i64: 8, 256>}]} {
    %c0 = arith.constant 0 : index
    %c0_0 = arith.constant 0 : index
    %0 = vector.load %arg4[%c0, %c0_0] : memref<8x256xf32, #tpu.memory_space<vmem>>, vector<8x256xf32>
    %c0_1 = arith.constant 0 : index
    %c0_2 = arith.constant 0 : index
    %1 = vector.load %arg2[%c0_1, %c0_2] : memref<8x1xf32, #tpu.memory_space<vmem>>, vector<8x1xf32>
    %2 = vector.broadcast %1 : vector<8x1xf32> to vector<8x256xf32>
    %3 = arith.mulf %0, %2 : vector<8x256xf32>
    %c0_3 = arith.constant 0 : index
    %c0_4 = arith.constant 0 : index
    %4 = vector.load %arg3[%c0_3, %c0_4] : memref<8x1xf32, #tpu.memory_space<vmem>>, vector<8x1xf32>
    %5 = vector.broadcast %4 : vector<8x1xf32> to vector<8x256xf32>
    %6 = arith.addf %3, %5 : vector<8x256xf32>
    %c0_5 = arith.constant 0 : index
    %c0_6 = arith.constant 0 : index
    %7 = vector.load %arg5[%c0_5, %c0_6] : memref<8x256xf32, #tpu.memory_space<vmem>>, vector<8x256xf32>
    tpu.vector_store %arg5[%c0_5, %c0_6], %6 {strides = array<i32>} : memref<8x256xf32, #tpu.memory_space<vmem>>, vector<8x256xf32>,
    return
  }
  func.func @transform_0(%arg0: i32, %arg1: i32) -> (i32, i32) {
    %c0_i32 = arith.constant 0 : i32
    %c0_i32_0 = arith.constant 0 : i32
    return %arg0, %c0_i32 : i32, i32
  }
  func.func @transform_1(%arg0: i32, %arg1: i32) -> (i32, i32) {
    %c0_i32 = arith.constant 0 : i32
    %c0_i32_0 = arith.constant 0 : i32
    return %arg0, %c0_i32 : i32, i32
  }
  func.func @transform_2(%arg0: i32, %arg1: i32) -> (i32, i32) {
    %c0_i32 = arith.constant 0 : i32
    return %arg0, %arg1 : i32, i32
  }
  func.func @transform_3(%arg0: i32, %arg1: i32) -> (i32, i32) {
    %c0_i32 = arith.constant 0 : i32
    return %arg0, %arg1 : i32, i32
  }
}

</mosaic_0001>

<bundles_post_ra>
// kernel: tpu_custom_call.1
= control target key start
LH: loop header
LB: loop body
LE: loop exit
PB: predicated region body
PF: predicated region fallthrough
CT: control target
= control target key end

     0   :  { %v74_v1 = vmov 0   ;;  %s111_s0 = inlined_call_operand.vmem [shape: f32[8,1], index: 0, kind: input, shape index: {}]   ;;  %s112_s1 = inlined_call_operand.vmem [shape: f32[8,1], index: 1, kind: input, shape index: {}]   ;;  %s113_s2 = inlined_call_operand.vmem [shape: f32[8,256], index: 2, kind: input, shape index: {}]   ;;  %s114_s3 = inlined_call_operand.hbm [shape: f32[8,256], index: 3, kind: output, shape index: {}]  }
   0x1   :  { %v17_v0 = vld [vmem:[%s111_s0] sm:$0xff]  ;;  %51 = vset.pattern.permute.xlu0 %v74_v1 }
   0x2   :  { %8 = vsyncpa [#allocation3], 0  ;;  %20 = vperm.xlu0 %51, %v17_v0   ;;  %v25_v2 = vld [vmem:[%s112_s1] sm:$0xff]  ;;  %v16_v5 = vld [vmem:[%s113_s2 + $0x8] sm:$0xff]  ;;  %s75_s20 = smov [#allocation2]  }
   0x3   :  { %v15_v4 = vld [vmem:[%s113_s2] sm:$0xff]  ;;  %s41_s0 = sshll.u32 %s75_s20, 4  ;;  %s42_s0 = int_to_ptr.vmem [resolvable:$true] %s41_s0 }
   0x4   :  { %s52_s1 = scalar_lea.vmem %s42_s0, 256  ;;  %p57_p1 = scmp.lt.s32.totalorder %s42_s0, %s42_s0 }
   0x5   :  { %p53_p0 = scmp.ne.s32.totalorder %s42_s0, %s52_s1  ;;  %p58_p2 = scmp.lt.s32.totalorder %s52_s1, %s52_s1 }
   0x6   :  { %28 = vperm.xlu0 %51, %v25_v2  }
   0x7   :  { %p59_p3 = por %p58_p2, %p57_p1 }
   0x9   :  { %p60_p4 = pnand %p59_p3, %p53_p0 }
  0x7d   :  { %v21_v3 = vpop.permute.xlu0 %20 }
  0x7e   :  { %v23_v6 = vmul.f32 %v21_v3, %v15_v4  ;;  %v24_v7 = vmul.f32 %v21_v3, %v16_v5 }
  0x81   :  { %v29_v8 = vpop.permute.xlu0 %28 }
  0x82   :  { %v31_v9 = vadd.f32 %v29_v8, %v23_v6  ;;  %v32_v10 = vadd.f32 %v29_v8, %v24_v7 }
  0x84   :  { %33 = vst [vmem:[#allocation2] sm:$0xff] %v31_v9  ;;  %34 = vst [vmem:[#allocation2 + $0x8] sm:$0xff] %v32_v10 }
  0x85   :  { %63 = shalt.err (!%p60_p4)
}
  0x86   :  { %44 = dma.vmem_to_hbm [thread:$0]  %s42_s0, 256, %s114_s3, [#allocation3]  }
  0x87   :  { %72 = dma.done.wait [#allocation3], 256  }
  0x88   :  { %73 = vsyncadd [#allocation3], 4294967040 }
  0x89   :  { %48 = vsyncpa [#allocation3], 1 }

</bundles_post_ra>
